<compile_context>
chip_gen: v5e
topology: v5e:2x2
jax: 0.10.0
libtpu: 0.0.40
codegen_flags: <defaults>
</compile_context>

<pallas_src>
import functools

import jax
import jax.numpy as jnp
from jax.experimental import pallas as pl
from jax.experimental.pallas import tpu as pltpu

N_INPUTS = 3072  # hard-coded by the PyTorch forward's reshape (x.reshape(B, 3072))
LANE = 128
SUBLANE = 8


def _round_up(x, m):
    return ((x + m - 1) // m) * m


def _mlp_fused_kernel(*refs, n_layers: int):
    """Fused MLP: refs = (x, w1, b1, w2, b2, ..., wN, bN, out).

    x tile is f32 (TM, 3072); weights are bf16 (K_pad, N_pad) resident in VMEM;
    biases are f32 (1, N_pad). All matmuls accumulate in f32 on the MXU; ReLU
    is applied in-register (intermediates are never stored to HBM).
    """
    x_ref = refs[0]
    o_ref = refs[-1]
    wb = refs[1:-1]

    h = x_ref[...].astype(jnp.bfloat16)
    for i in range(n_layers):
        w = wb[2 * i][...]        # bf16 (K_pad, N_pad)
        b = wb[2 * i + 1][...]    # f32  (1, N_pad)
        h = jnp.dot(h, w, preferred_element_type=jnp.float32) + b
        if i != n_layers - 1:
            h = jnp.maximum(h, 0.0).astype(jnp.bfloat16)
    o_ref[...] = h.astype(o_ref.dtype)


def init_mlp_params(key, n_inputs, n_hidden, n_classes):
    """Init mirroring the PyTorch module:
      - first layer: xavier_normal_ weights
      - other layers: kaiming_normal_ (fan_in, relu gain) weights
      - biases: PyTorch Linear default U(-1/sqrt(fan_in), 1/sqrt(fan_in))
    Weights are stored transposed as (in, out), zero-padded to multiples of 128
    on both dims, and cast to bf16. Biases are zero-padded f32 of shape (1, N_pad).
    """
    dims = [n_inputs] + list(reversed(list(n_hidden))) + [n_classes]
    layers = []
    for i in range(len(dims) - 1):
        fan_in, fan_out = dims[i], dims[i + 1]
        key, k_w, k_b = jax.random.split(key, 3)
        if i == 0:
            std = (2.0 / (fan_in + fan_out)) ** 0.5   # xavier normal
        else:
            std = (2.0 / fan_in) ** 0.5               # kaiming normal (fan_in, relu)
        w = jax.random.normal(k_w, (fan_in, fan_out), jnp.float32) * std
        bound = 1.0 / (fan_in ** 0.5)
        b = jax.random.uniform(k_b, (fan_out,), jnp.float32, -bound, bound)

        k_pad = _round_up(fan_in, LANE)
        n_pad = _round_up(fan_out, LANE)
        w_pad = jnp.zeros((k_pad, n_pad), jnp.float32).at[:fan_in, :fan_out].set(w)
        b_pad = jnp.zeros((1, n_pad), jnp.float32).at[0, :fan_out].set(b)
        layers.append((w_pad.astype(jnp.bfloat16), b_pad))
    return layers


def mlp_forward(x_nchw, params, n_classes, *, tm=256):
    """Forward pass equivalent to MLP.forward: flatten to (B, 3072), run the
    fused Pallas MLP kernel, slice logits back to n_classes."""
    B = x_nchw.shape[0]
    x = x_nchw.reshape(B, N_INPUTS).astype(jnp.float32)

    # Batch tile: multiple of 8 (f32 sublane), capped at `tm`; pad B to a
    # whole number of tiles so every block is legal and full.
    tm_eff = min(tm, _round_up(B, SUBLANE))
    tm_eff = _round_up(tm_eff, SUBLANE)
    b_pad = _round_up(B, tm_eff)
    if b_pad != B:
        x = jnp.pad(x, ((0, b_pad - B), (0, 0)))

    n_layers = len(params)
    n_out_pad = params[-1][0].shape[1]
    grid = (b_pad // tm_eff,)

    in_specs = [pl.BlockSpec((tm_eff, N_INPUTS), lambda i: (i, 0))]
    flat_args = [x]
    flops = 0
    bytes_accessed = int(x.size) * 4 + b_pad * n_out_pad * 4
    for (w, b) in params:
        k_pad, np_pad = w.shape
        # Weights/biases: full-array blocks, same block index every grid step
        # -> DMA'd once, resident in VMEM across all batch tiles.
        in_specs.append(pl.BlockSpec((k_pad, np_pad), lambda i: (0, 0)))
        in_specs.append(pl.BlockSpec((1, np_pad), lambda i: (0, 0)))
        flat_args += [w, b]
        flops += 2 * b_pad * k_pad * np_pad
        bytes_accessed += int(w.size) * 2 + int(b.size) * 4

    kernel = functools.partial(_mlp_fused_kernel, n_layers=n_layers)
    out = pl.pallas_call(
        kernel,
        out_shape=jax.ShapeDtypeStruct((b_pad, n_out_pad), jnp.float32),
        grid=grid,
        in_specs=in_specs,
        out_specs=pl.BlockSpec((tm_eff, n_out_pad), lambda i: (i, 0)),
        compiler_params=pltpu.CompilerParams(
            dimension_semantics=("parallel",)),
        cost_estimate=pl.CostEstimate(
            flops=int(flops), transcendentals=0,
            bytes_accessed=int(bytes_accessed)),
    )(*flat_args)

    return out[:B, :n_classes]  # logits (B, n_classes); no softmax (matches module)


def mlp_forward_reference(x_nchw, params, n_classes):
    """Plain-JAX reference using the same bf16 weights / f32 accumulation."""
    B = x_nchw.shape[0]
    h = x_nchw.reshape(B, N_INPUTS).astype(jnp.bfloat16)
    n_layers = len(params)
    for i, (w, b) in enumerate(params):
        h = jnp.dot(h, w, preferred_element_type=jnp.float32) + b
        if i != n_layers - 1:
            h = jnp.maximum(h, 0.0).astype(jnp.bfloat16)
    return h[:, :n_classes]


if __name__ == "__main__":
    key = jax.random.PRNGKey(0)
    k_x, k_p = jax.random.split(key)

    # The module's forward requires exactly 3072 input features ->
    # CIFAR-like NCHW (B=2, C=3, H=32, W=32).
    B, C, H, W = 2, 3, 32, 32
    n_hidden = [128, 64]
    n_classes = 10

    x = jax.random.normal(k_x, (B, C, H, W), jnp.float32)
    params = init_mlp_params(k_p, N_INPUTS, n_hidden, n_classes)

    out = mlp_forward(x, params, n_classes)
    out = jax.block_until_ready(out)

    ref = mlp_forward_reference(x, params, n_classes)
    assert out.shape == (B, n_classes)
    assert jnp.allclose(out, ref, atol=2e-3, rtol=2e-3), "mismatch vs reference"

    print("KERNEL_OK")
</pallas_src>

<mosaic_0001>
module attributes {stable_mosaic.version = 11 : i64} {
  func.func @_mlp_fused_kernel(%arg0: i32, %arg1: memref<8x3072xf32, #tpu.memory_space<vmem>>, %arg2: memref<3072x128xbf16, #tpu.memory_space<vmem>>, %arg3: memref<1x128xf32, #tpu.memory_space<vmem>>, %arg4: memref<128x128xbf16, #tpu.memory_space<vmem>>, %arg5: memref<1x128xf32, #tpu.memory_space<vmem>>, %arg6: memref<128x128xbf16, #tpu.memory_space<vmem>>, %arg7: memref<1x128xf32, #tpu.memory_space<vmem>>, %arg8: memref<8x128xf32, #tpu.memory_space<vmem>>) attributes {dimension_semantics = [#tpu.dimension_semantics<parallel>], iteration_bounds = array<i64: 1>, scalar_prefetch = 0 : i64, scratch_operands = 0 : i64, tpu.core_type = #tpu.core_type<tc>, window_params = [{transform_indices = @transform_0, window_bounds = array<i64: 8, 3072>}, {pipeline_mode = #tpu.pipeline_mode<synchronous>, transform_indices = @transform_1, window_bounds = array<i64: 3072, 128>}, {pipeline_mode = #tpu.pipeline_mode<synchronous>, transform_indices = @transform_2, window_bounds = array<i64: 1, 128>}, {pipeline_mode = #tpu.pipeline_mode<synchronous>, transform_indices = @transform_3, window_bounds = array<i64: 128, 128>}, {pipeline_mode = #tpu.pipeline_mode<synchronous>, transform_indices = @transform_4, window_bounds = array<i64: 1, 128>}, {pipeline_mode = #tpu.pipeline_mode<synchronous>, transform_indices = @transform_5, window_bounds = array<i64: 128, 128>}, {pipeline_mode = #tpu.pipeline_mode<synchronous>, transform_indices = @transform_6, window_bounds = array<i64: 1, 128>}, {transform_indices = @transform_7, window_bounds = array<i64: 8, 128>}]} {
    %c0 = arith.constant 0 : index
    %c0_0 = arith.constant 0 : index
    %0 = vector.load %arg1[%c0, %c0_0] : memref<8x3072xf32, #tpu.memory_space<vmem>>, vector<8x3072xf32>
    %1 = arith.truncf %0 : vector<8x3072xf32> to vector<8x3072xbf16>
    %c0_1 = arith.constant 0 : index
    %c0_2 = arith.constant 0 : index
    %2 = vector.load %arg2[%c0_1, %c0_2] : memref<3072x128xbf16, #tpu.memory_space<vmem>>, vector<3072x128xbf16>
    %c0_3 = arith.constant 0 : index
    %c0_4 = arith.constant 0 : index
    %3 = vector.load %arg3[%c0_3, %c0_4] : memref<1x128xf32, #tpu.memory_space<vmem>>, vector<1x128xf32>
    %cst = arith.constant dense<0.000000e+00> : vector<8x128xf32>
    %4 = tpu.matmul %1, %2, %cst {dimension_numbers = #tpu.dot_dimension_numbers<[1], [0], [0], [1], [0, 0, 1, 1], [], []>} : vector<8x3072xbf16>, vector<3072x128xbf16>, vector<8x128xf32> -> vector<8x128xf32>
    %5 = vector.broadcast %3 : vector<1x128xf32> to vector<8x128xf32>
    %6 = arith.addf %4, %5 : vector<8x128xf32>
    %cst_5 = arith.constant 0.000000e+00 : f32
    %7 = vector.broadcast %cst_5 : f32 to vector<8x128xf32>
    %8 = arith.maximumf %6, %7 : vector<8x128xf32>
    %9 = arith.truncf %8 : vector<8x128xf32> to vector<8x128xbf16>
    %c0_6 = arith.constant 0 : index
    %c0_7 = arith.constant 0 : index
    %10 = vector.load %arg4[%c0_6, %c0_7] : memref<128x128xbf16, #tpu.memory_space<vmem>>, vector<128x128xbf16>
    %c0_8 = arith.constant 0 : index
    %c0_9 = arith.constant 0 : index
    %11 = vector.load %arg5[%c0_8, %c0_9] : memref<1x128xf32, #tpu.memory_space<vmem>>, vector<1x128xf32>
    %cst_10 = arith.constant dense<0.000000e+00> : vector<8x128xf32>
    %12 = tpu.matmul %9, %10, %cst_10 {dimension_numbers = #tpu.dot_dimension_numbers<[1], [0], [0], [1], [0, 0, 1, 1], [], []>} : vector<8x128xbf16>, vector<128x128xbf16>, vector<8x128xf32> -> vector<8x128xf32>
    %13 = vector.broadcast %11 : vector<1x128xf32> to vector<8x128xf32>
    %14 = arith.addf %12, %13 : vector<8x128xf32>
    %cst_11 = arith.constant 0.000000e+00 : f32
    %15 = vector.broadcast %cst_11 : f32 to vector<8x128xf32>
    %16 = arith.maximumf %14, %15 : vector<8x128xf32>
    %17 = arith.truncf %16 : vector<8x128xf32> to vector<8x128xbf16>
    %c0_12 = arith.constant 0 : index
    %c0_13 = arith.constant 0 : index
    %18 = vector.load %arg6[%c0_12, %c0_13] : memref<128x128xbf16, #tpu.memory_space<vmem>>, vector<128x128xbf16>
    %c0_14 = arith.constant 0 : index
    %c0_15 = arith.constant 0 : index
    %19 = vector.load %arg7[%c0_14, %c0_15] : memref<1x128xf32, #tpu.memory_space<vmem>>, vector<1x128xf32>
    %cst_16 = arith.constant dense<0.000000e+00> : vector<8x128xf32>
    %20 = tpu.matmul %17, %18, %cst_16 {dimension_numbers = #tpu.dot_dimension_numbers<[1], [0], [0], [1], [0, 0, 1, 1], [], []>} : vector<8x128xbf16>, vector<128x128xbf16>, vector<8x128xf32> -> vector<8x128xf32>
    %21 = vector.broadcast %19 : vector<1x128xf32> to vector<8x128xf32>
    %22 = arith.addf %20, %21 : vector<8x128xf32>
    %c0_17 = arith.constant 0 : index
    %c0_18 = arith.constant 0 : index
    %23 = vector.load %arg8[%c0_17, %c0_18] : memref<8x128xf32, #tpu.memory_space<vmem>>, vector<8x128xf32>
    tpu.vector_store %arg8[%c0_17, %c0_18], %22 {strides = array<i32>} : memref<8x128xf32, #tpu.memory_space<vmem>>, vector<8x128xf32>,
    return
  }
  func.func @transform_0(%arg0: i32) -> (i32, i32) {
    %c0_i32 = arith.constant 0 : i32
    %c0_i32_0 = arith.constant 0 : i32
    return %arg0, %c0_i32 : i32, i32
  }
  func.func @transform_1(%arg0: i32) -> (i32, i32) {
    %c0_i32 = arith.constant 0 : i32
    %c0_i32_0 = arith.constant 0 : i32
    %c0_i32_1 = arith.constant 0 : i32
    return %c0_i32, %c0_i32_0 : i32, i32
  }
  func.func @transform_2(%arg0: i32) -> (i32, i32) {
    %c0_i32 = arith.constant 0 : i32
    %c0_i32_0 = arith.constant 0 : i32
    %c0_i32_1 = arith.constant 0 : i32
    return %c0_i32, %c0_i32_0 : i32, i32
  }
  func.func @transform_3(%arg0: i32) -> (i32, i32) {
    %c0_i32 = arith.constant 0 : i32
    %c0_i32_0 = arith.constant 0 : i32
    %c0_i32_1 = arith.constant 0 : i32
    return %c0_i32, %c0_i32_0 : i32, i32
  }
  func.func @transform_4(%arg0: i32) -> (i32, i32) {
    %c0_i32 = arith.constant 0 : i32
    %c0_i32_0 = arith.constant 0 : i32
    %c0_i32_1 = arith.constant 0 : i32
    return %c0_i32, %c0_i32_0 : i32, i32
  }
  func.func @transform_5(%arg0: i32) -> (i32, i32) {
    %c0_i32 = arith.constant 0 : i32
    %c0_i32_0 = arith.constant 0 : i32
    %c0_i32_1 = arith.constant 0 : i32
    return %c0_i32, %c0_i32_0 : i32, i32
  }
  func.func @transform_6(%arg0: i32) -> (i32, i32) {
    %c0_i32 = arith.constant 0 : i32
    %c0_i32_0 = arith.constant 0 : i32
    %c0_i32_1 = arith.constant 0 : i32
    return %c0_i32, %c0_i32_0 : i32, i32
  }
  func.func @transform_7(%arg0: i32) -> (i32, i32) {
    %c0_i32 = arith.constant 0 : i32
    %c0_i32_0 = arith.constant 0 : i32
    return %arg0, %c0_i32 : i32, i32
  }
}

</mosaic_0001>

<bundles_post_ra>
// kernel: tpu_custom_call.1
= control target key start
LH: loop header
LB: loop body
LE: loop exit
PB: predicated region body
PF: predicated region fallthrough
CT: control target
= control target key end

     0   :  { %12 = vsyncpa [#allocation3], 0  ;;  %s3423_s0 = inlined_call_operand.hbm [shape: f32[8,3072], index: 0, kind: input, shape index: {}]   ;;  %s3424_s1 = inlined_call_operand.hbm [shape: bf16[3072,128], index: 1, kind: input, shape index: {}]   ;;  %s3425_s2 = inlined_call_operand.vmem [shape: f32[1,128], index: 2, kind: input, shape index: {}]   ;;  %s3426_s3 = inlined_call_operand.hbm [shape: bf16[128,128], index: 3, kind: input, shape index: {}]   ;;  %s3427_s4 = inlined_call_operand.vmem [shape: f32[1,128], index: 4, kind: input, shape index: {}]   ;;  %s3428_s5 = inlined_call_operand.hbm [shape: bf16[128,128], index: 5, kind: input, shape index: {}]   ;;  %s3429_s6 = inlined_call_operand.vmem [shape: f32[1,128], index: 6, kind: input, shape index: {}]   ;;  %s3430_s7 = inlined_call_operand.hbm [shape: f32[8,128], index: 7, kind: output, shape index: {}]  }
   0x1   :  { %13 = vsyncpa [#allocation6], 0 }
   0x2   :  { %14 = vsyncpa [#allocation9], 0  ;;  %s31_s26 = sshll.u32 %s3424_s1, 4  ;;  %s32_s26 = int_to_ptr.hbm [resolvable:$true] %s31_s26 }
   0x3   :  { %15 = vsyncpa [#allocation4], 0  ;;  %s3352_s27 = smov [#allocation5]   ;;  %s21_s8 = sshll.u32 %s3423_s0, 4  ;;  %s22_s8 = int_to_ptr.hbm [resolvable:$true] %s21_s8 }
   0x4   :  { %s33_s28 = sshll.u32 %s3352_s27, 4  ;;  %s3353_s9 = smov 64   ;;  %s34_s28 = int_to_ptr.vmem [resolvable:$true] %s33_s28 }
   0x5   :  { %s3354_s10 = smov 4   ;;  %s3355_s11 = smov [#allocation2]  }
   0x6   :  { %39 = dma.hbm_to_vmem [thread:$0]  %s32_s26, 24576, %s34_s28, [#allocation6], %s3353_s9, %s3353_s9, %s3354_s10  }
   0x7   :  { %s23_s12 = sshll.u32 %s3355_s11, 4  ;;  %s46_s15 = sshll.u32 %s3426_s3, 4  ;;  %s24_s12 = int_to_ptr.vmem [resolvable:$true] %s23_s12  ;;  %s47_s15 = int_to_ptr.hbm [resolvable:$true] %s46_s15 }
   0x8   :  { %26 = dma.hbm_to_vmem [thread:$0]  %s22_s8, 3072, %s24_s12, [#allocation3]  }
   0x9   :  { %s61_s17 = sshll.u32 %s3428_s5, 4  ;;  %s3356_s18 = smov [#allocation7]   ;;  %s62_s17 = int_to_ptr.hbm [resolvable:$true] %s61_s17 }
   0xa   :  { %s48_s19 = sshll.u32 %s3356_s18, 4  ;;  %s3357_s0 = smov [#allocation8]   ;;  %s49_s19 = int_to_ptr.vmem [resolvable:$true] %s48_s19 }
   0xb   :  { %54 = dma.hbm_to_vmem [thread:$0]  %s47_s15, 1024, %s49_s19, [#allocation6], %s3353_s9, %s3353_s9, %s3354_s10  }
   0xc   :  { %s63_s20 = sshll.u32 %s3357_s0, 4  ;;  %s64_s20 = int_to_ptr.vmem [resolvable:$true] %s63_s20 }
   0xd   :  { %69 = dma.hbm_to_vmem [thread:$0]  %s62_s17, 1024, %s64_s20, [#allocation9], %s3353_s9, %s3353_s9, %s3354_s10  }
   0xe   :  { %3344 = dma.done.wait [#allocation3], 3072  }
   0xf   :  { %3345 = vsyncadd [#allocation3], 4294964224 }
  0x10   :  { %3346 = dma.done.wait [#allocation6], 25600  }
  0x11   :  { %3347 = vsyncadd [#allocation6], 4294941696 }
  0x12   :  { %3348 = dma.done.wait [#allocation9], 1024  }
  0x13   :  { %3349 = vsyncadd [#allocation9], 4294966272  ;;  %v3013_v0 = vld [vmem:[#allocation5 + $0x38] sm:$0xff]  ;;  %v3012_v4 = vld [vmem:[#allocation5 + $0x30] sm:$0xff]  ;;  %s3358_s24 = smov [#allocation10]   ;;  %s2162_s28 = sshll.u32 %s3430_s7, 4  ;;  %s2163_s28 = int_to_ptr.hbm [resolvable:$true] %s2162_s28 }
  0x14   :  { %v3021_v1 = vld [vmem:[#allocation5 + $0x78] sm:$0xff]  ;;  %1676 = vmatpush.bf16.msra.mxu0 %v3013_v0  ;;  %v3020_v5 = vld [vmem:[#allocation5 + $0x70] sm:$0xff]  ;;  %v3011_v8 = vld [vmem:[#allocation5 + $0x28] sm:$0xff]  ;;  %s2160_s25 = sshll.u32 %s3358_s24, 4  ;;  %s2161_s25 = int_to_ptr.vmem [resolvable:$true] %s2160_s25 }
  0x15   :  { %v3029_v2 = vld [vmem:[#allocation5 + $0xb8] sm:$0xff]  ;;  %1689 = vmatpush.bf16.msra.mxu1 %v3021_v1  ;;  %v3028_v6 = vld [vmem:[#allocation5 + $0xb0] sm:$0xff]  ;;  %v3019_v9 = vld [vmem:[#allocation5 + $0x68] sm:$0xff] }
  0x16   :  { %v3037_v3 = vld [vmem:[#allocation5 + $0xf8] sm:$0xff]  ;;  %1702 = vmatpush.bf16.msra.mxu2 %v3029_v2  ;;  %v3036_v7 = vld [vmem:[#allocation5 + $0xf0] sm:$0xff]  ;;  %v3027_v10 = vld [vmem:[#allocation5 + $0xa8] sm:$0xff] }
  0x17   :  { %1715 = vmatpush.bf16.msra.mxu3 %v3037_v3  ;;  %v3035_v11 = vld [vmem:[#allocation5 + $0xe8] sm:$0xff]  ;;  %v3010_v12 = vld [vmem:[#allocation5 + $0x20] sm:$0xff]  ;;  %v3009_v16 = vld [vmem:[#allocation5 + $0x18] sm:$0xff] }
  0x18   :  { %1677 = vmatpush.bf16.msra.mxu0 %v3012_v4  ;;  %v3018_v13 = vld [vmem:[#allocation5 + $0x60] sm:$0xff]  ;;  %v3017_v17 = vld [vmem:[#allocation5 + $0x58] sm:$0xff]  ;;  %v3008_v20 = vld [vmem:[#allocation5 + $0x10] sm:$0xff] }
  0x19   :  { %1690 = vmatpush.bf16.msra.mxu1 %v3020_v5  ;;  %v3026_v14 = vld [vmem:[#allocation5 + $0xa0] sm:$0xff]  ;;  %v3025_v18 = vld [vmem:[#allocation5 + $0x98] sm:$0xff]  ;;  %v3016_v21 = vld [vmem:[#allocation5 + $0x50] sm:$0xff] }
  0x1a   :  { %1703 = vmatpush.bf16.msra.mxu2 %v3028_v6  ;;  %v3034_v15 = vld [vmem:[#allocation5 + $0xe0] sm:$0xff]  ;;  %v3033_v19 = vld [vmem:[#allocation5 + $0xd8] sm:$0xff]  ;;  %v3024_v22 = vld [vmem:[#allocation5 + $0x90] sm:$0xff] }
  0x1b   :  { %1716 = vmatpush.bf16.msra.mxu3 %v3036_v7  ;;  %v3032_v23 = vld [vmem:[#allocation5 + $0xd0] sm:$0xff]  ;;  %v3007_v24 = vld [vmem:[#allocation5 + $0x8] sm:$0xff]  ;;  %v3006_v28 = vld [vmem:[#allocation5] sm:$0xff] }
  0x1c   :  { %1678 = vmatpush.bf16.msra.mxu0 %v3011_v8  ;;  %v3015_v25 = vld [vmem:[#allocation5 + $0x48] sm:$0xff]  ;;  %v3014_v29 = vld [vmem:[#allocation5 + $0x40] sm:$0xff]  ;;  %v3045_v32 = vld [vmem:[#allocation5 + $0x138] sm:$0xff] }
  0x1d   :  { %1691 = vmatpush.bf16.msra.mxu1 %v3019_v9  ;;  %v3023_v26 = vld [vmem:[#allocation5 + $0x88] sm:$0xff]  ;;  %v3022_v30 = vld [vmem:[#allocation5 + $0x80] sm:$0xff]  ;;  %v90_v33 = vld [vmem:[#allocation2 + $0x10] sm:$0xff] }
  0x1e   :  { %1704 = vmatpush.bf16.msra.mxu2 %v3027_v10  ;;  %v3031_v27 = vld [vmem:[#allocation5 + $0xc8] sm:$0xff]  ;;  %v3030_v31 = vld [vmem:[#allocation5 + $0xc0] sm:$0xff]  ;;  %v3053_v35 = vld [vmem:[#allocation5 + $0x178] sm:$0xff]  ;;  %v114_v40 = vpack.c.bf16 %v90_v33, %v90_v33 }
  0x1f   :  { %1717 = vmatpush.bf16.msra.mxu3 %v3035_v11  ;;  %v88_v34 = vld [vmem:[#allocation2] sm:$0xff]  ;;  %v91_v36 = vld [vmem:[#allocation2 + $0x18] sm:$0xff]  ;;  %v89_v37 = vld [vmem:[#allocation2 + $0x8] sm:$0xff] }
  0x20   :  { %1679 = vmatpush.bf16.msra.mxu0 %v3010_v12  ;;  %v3061_v38 = vld [vmem:[#allocation5 + $0x1b8] sm:$0xff]  ;;  %v112_v41 = vpack.c.bf16 %v88_v34, %v88_v34  ;;  %v115_v42 = vpack.c.bf16 %v91_v36, %v91_v36  ;;  %v113_v43 = vpack.c.bf16 %v89_v37, %v89_v37  ;;  %v3044_v44 = vld [vmem:[#allocation5 + $0x130] sm:$0xff]  ;;  %v3043_v48 = vld [vmem:[#allocation5 + $0x128] sm:$0xff] }
  0x21   :  { %1692 = vmatpush.bf16.msra.mxu1 %v3018_v13  ;;  %v3069_v39 = vld [vmem:[#allocation5 + $0x1f8] sm:$0xff]  ;;  %v3052_v45 = vld [vmem:[#allocation5 + $0x170] sm:$0xff]  ;;  %v3051_v49 = vld [vmem:[#allocation5 + $0x168] sm:$0xff] }
  0x22   :  { %1705 = vmatpush.bf16.msra.mxu2 %v3026_v14  ;;  %v3060_v46 = vld [vmem:[#allocation5 + $0x1b0] sm:$0xff]  ;;  %v3059_v50 = vld [vmem:[#allocation5 + $0x1a8] sm:$0xff]  ;;  %v3042_v52 = vld [vmem:[#allocation5 + $0x120] sm:$0xff] }
  0x23   :  { %1718 = vmatpush.bf16.msra.mxu3 %v3034_v15  ;;  %v3068_v47 = vld [vmem:[#allocation5 + $0x1f0] sm:$0xff]  ;;  %v3067_v51 = vld [vmem:[#allocation5 + $0x1e8] sm:$0xff]  ;;  %v3050_v53 = vld [vmem:[#allocation5 + $0x160] sm:$0xff] }
  0x24   :  { %1680 = vmatpush.bf16.msra.mxu0 %v3009_v16  ;;  %v3058_v54 = vld [vmem:[#allocation5 + $0x1a0] sm:$0xff]  ;;  %v3041_v56 = vld [vmem:[#allocation5 + $0x118] sm:$0xff]  ;;  %v3040_v60 = vld [vmem:[#allocation5 + $0x110] sm:$0xff] }
  0x25   :  { %1693 = vmatpush.bf16.msra.mxu1 %v3017_v17  ;;  %v3066_v55 = vld [vmem:[#allocation5 + $0x1e0] sm:$0xff]  ;;  %v3049_v57 = vld [vmem:[#allocation5 + $0x158] sm:$0xff]  ;;  %v3048_v61 = vld [vmem:[#allocation5 + $0x150] sm:$0xff] }
  0x26   :  { %1706 = vmatpush.bf16.msra.mxu2 %v3025_v18  ;;  %v3057_v58 = vld [vmem:[#allocation5 + $0x198] sm:$0xff]  ;;  %v3056_v62 = vld [vmem:[#allocation5 + $0x190] sm:$0xff]  ;;  %v3039_v0 = vld [vmem:[#allocation5 + $0x108] sm:$0xff] }
  0x27   :  { %1719 = vmatpush.bf16.msra.mxu3 %v3033_v19  ;;  %v3065_v59 = vld [vmem:[#allocation5 + $0x1d8] sm:$0xff]  ;;  %v3064_v63 = vld [vmem:[#allocation5 + $0x1d0] sm:$0xff]  ;;  %v3047_v1 = vld [vmem:[#allocation5 + $0x148] sm:$0xff] }
  0x28   :  { %1681 = vmatpush.bf16.msra.mxu0 %v3008_v20  ;;  %v3055_v2 = vld [vmem:[#allocation5 + $0x188] sm:$0xff]  ;;  %v3038_v4 = vld [vmem:[#allocation5 + $0x100] sm:$0xff]  ;;  %v3077_v8 = vld [vmem:[#allocation5 + $0x238] sm:$0xff] }
  0x29   :  { %1694 = vmatpush.bf16.msra.mxu1 %v3016_v21  ;;  %v3063_v3 = vld [vmem:[#allocation5 + $0x1c8] sm:$0xff]  ;;  %v3046_v5 = vld [vmem:[#allocation5 + $0x140] sm:$0xff]  ;;  %v94_v9 = vld [vmem:[#allocation2 + $0x30] sm:$0xff] }
  0x2a   :  { %1707 = vmatpush.bf16.msra.mxu2 %v3024_v22  ;;  %v3054_v6 = vld [vmem:[#allocation5 + $0x180] sm:$0xff]  ;;  %v3085_v11 = vld [vmem:[#allocation5 + $0x278] sm:$0xff]  ;;  %v93_v13 = vld [vmem:[#allocation2 + $0x28] sm:$0xff]  ;;  %v118_v16 = vpack.c.bf16 %v94_v9, %v94_v9 }
  0x2b   :  { %1720 = vmatpush.bf16.msra.mxu3 %v3032_v23  ;;  %v3062_v7 = vld [vmem:[#allocation5 + $0x1c0] sm:$0xff]  ;;  %v95_v12 = vld [vmem:[#allocation2 + $0x38] sm:$0xff]  ;;  %v117_v19 = vpack.c.bf16 %v93_v13, %v93_v13  ;;  %v3076_v20 = vld [vmem:[#allocation5 + $0x230] sm:$0xff] }
  0x2c   :  { %1682 = vmatpush.bf16.msra.mxu0 %v3007_v24  ;;  %v92_v10 = vld [vmem:[#allocation2 + $0x20] sm:$0xff]  ;;  %v3093_v14 = vld [vmem:[#allocation5 + $0x2b8] sm:$0xff]  ;;  %v119_v18 = vpack.c.bf16 %v95_v12, %v95_v12  ;;  %v3084_v21 = vld [vmem:[#allocation5 + $0x270] sm:$0xff] }
  0x2d   :  { %1695 = vmatpush.bf16.msra.mxu1 %v3015_v25  ;;  %v3101_v15 = vld [vmem:[#allocation5 + $0x2f8] sm:$0xff]  ;;  %v116_v17 = vpack.c.bf16 %v92_v10, %v92_v10  ;;  %v3092_v22 = vld [vmem:[#allocation5 + $0x2b0] sm:$0xff]  ;;  %v3075_v24 = vld [vmem:[#allocation5 + $0x228] sm:$0xff] }
  0x2e   :  { %1708 = vmatpush.bf16.msra.mxu2 %v3023_v26  ;;  %v3100_v23 = vld [vmem:[#allocation5 + $0x2f0] sm:$0xff]  ;;  %v3083_v25 = vld [vmem:[#allocation5 + $0x268] sm:$0xff]  ;;  %v3081_v33 = vld [vmem:[#allocation5 + $0x258] sm:$0xff] }
  0x2f   :  { %1721 = vmatpush.bf16.msra.mxu3 %v3031_v27  ;;  %v3091_v26 = vld [vmem:[#allocation5 + $0x2a8] sm:$0xff]  ;;  %v3089_v34 = vld [vmem:[#allocation5 + $0x298] sm:$0xff]  ;;  %v3072_v36 = vld [vmem:[#allocation5 + $0x210] sm:$0xff] }
  0x30   :  { %1683 = vmatpush.bf16.msra.mxu0 %v3006_v28  ;;  %v3099_v27 = vld [vmem:[#allocation5 + $0x2e8] sm:$0xff]  ;;  %v3074_v28 = vld [vmem:[#allocation5 + $0x220] sm:$0xff]  ;;  %v3080_v37 = vld [vmem:[#allocation5 + $0x250] sm:$0xff] }
  0x31   :  { %1696 = vmatpush.bf16.msra.mxu1 %v3014_v29  ;;  %v3082_v29 = vld [vmem:[#allocation5 + $0x260] sm:$0xff]  ;;  %v3113_v9 = vld [vmem:[#allocation5 + $0x358] sm:$0xff]  ;;  %v3104_v12 = vld [vmem:[#allocation5 + $0x310] sm:$0xff] }
  0x32   :  { %1709 = vmatpush.bf16.msra.mxu2 %v3022_v30  ;;  %v3090_v30 = vld [vmem:[#allocation5 + $0x2a0] sm:$0xff]  ;;  %v3121_v10 = vld [vmem:[#allocation5 + $0x398] sm:$0xff]  ;;  %v3112_v13 = vld [vmem:[#allocation5 + $0x350] sm:$0xff] }
  0x33   :  { %1722 = vmatpush.bf16.msra.mxu3 %v3030_v31  ;;  %1684 = vmatmul.bf16.vlgmr.msra.gmra.mxu0 %v112_v41  ;;  %v3098_v31 = vld [vmem:[#allocation5 + $0x2e0] sm:$0xff]  ;;  %v3079_v41 = vld [vmem:[#allocation5 + $0x248] sm:$0xff] }
  0x34   :  { %1728 = vmatpush.bf16.msrb.mxu0 %v3045_v32  ;;  %1697 = vmatmul.bf16.vlgmr.msra.gmra.mxu1 %v113_v43  ;;  %v3073_v32 = vld [vmem:[#allocation5 + $0x218] sm:$0xff]  ;;  %v3095_v43 = vld [vmem:[#allocation5 + $0x2c8] sm:$0xff] }
  0x35   :  { %1741 = vmatpush.bf16.msrb.mxu1 %v3053_v35  ;;  %1710 = vmatmul.bf16.vlgmr.msra.gmra.mxu2 %v114_v40  ;;  %v3097_v35 = vld [vmem:[#allocation5 + $0x2d8] sm:$0xff]  ;;  %v3071_v40 = vld [vmem:[#allocation5 + $0x208] sm:$0xff] }
  0x36   :  { %1754 = vmatpush.bf16.msrb.mxu2 %v3061_v38  ;;  %1723 = vmatmul.bf16.vlgmr.msra.gmra.mxu3 %v115_v42  ;;  %v3088_v38 = vld [vmem:[#allocation5 + $0x290] sm:$0xff]  ;;  %v3087_v42 = vld [vmem:[#allocation5 + $0x288] sm:$0xff] }
  0x37   :  { %1767 = vmatpush.bf16.msrb.mxu3 %v3069_v39  ;;  %v3096_v39 = vld [vmem:[#allocation5 + $0x2d0] sm:$0xff] }
  0x38   :  { %1729 = vmatpush.bf16.msrb.mxu0 %v3044_v44  ;;  %v3070_v44 = vld [vmem:[#allocation5 + $0x200] sm:$0xff] }
  0x39   :  { %1742 = vmatpush.bf16.msrb.mxu1 %v3052_v45  ;;  %v3078_v45 = vld [vmem:[#allocation5 + $0x240] sm:$0xff] }
  0x3a   :  { %1755 = vmatpush.bf16.msrb.mxu2 %v3060_v46  ;;  %v3086_v46 = vld [vmem:[#allocation5 + $0x280] sm:$0xff] }
  0x3b   :  { %1768 = vmatpush.bf16.msrb.mxu3 %v3068_v47  ;;  %v3094_v47 = vld [vmem:[#allocation5 + $0x2c0] sm:$0xff] }
  0x3c   :  { %1730 = vmatpush.bf16.msrb.mxu0 %v3043_v48  ;;  %v3109_v48 = vld [vmem:[#allocation5 + $0x338] sm:$0xff] }
  0x3d   :  { %1743 = vmatpush.bf16.msrb.mxu1 %v3051_v49  ;;  %v96_v49 = vld [vmem:[#allocation2 + $0x40] sm:$0xff] }
  0x3e   :  { %1756 = vmatpush.bf16.msrb.mxu2 %v3059_v50  ;;  %v98_v50 = vld [vmem:[#allocation2 + $0x50] sm:$0xff] }
  0x3f   :  { %1769 = vmatpush.bf16.msrb.mxu3 %v3067_v51  ;;  %v3117_v51 = vld [vmem:[#allocation5 + $0x378] sm:$0xff] }
  0x40   :  { %1731 = vmatpush.bf16.msrb.mxu0 %v3042_v52  ;;  %v97_v52 = vld [vmem:[#allocation2 + $0x48] sm:$0xff] }
  0x41   :  { %1744 = vmatpush.bf16.msrb.mxu1 %v3050_v53  ;;  %v99_v53 = vld [vmem:[#allocation2 + $0x58] sm:$0xff] }
  0x42   :  { %1757 = vmatpush.bf16.msrb.mxu2 %v3058_v54  ;;  %v3125_v54 = vld [vmem:[#allocation5 + $0x3b8] sm:$0xff] }
  0x43   :  { %1770 = vmatpush.bf16.msrb.mxu3 %v3066_v55  ;;  %v3133_v55 = vld [vmem:[#allocation5 + $0x3f8] sm:$0xff] }
  0x44   :  { %1732 = vmatpush.bf16.msrb.mxu0 %v3041_v56  ;;  %v120_v56 = vpack.c.bf16 %v96_v49, %v96_v49  ;;  %v3145_v49 = vld [vmem:[#allocation5 + $0x458] sm:$0xff] }
  0x45   :  { %1745 = vmatpush.bf16.msrb.mxu1 %v3049_v57  ;;  %v122_v57 = vpack.c.bf16 %v98_v50, %v98_v50  ;;  %v3153_v50 = vld [vmem:[#allocation5 + $0x498] sm:$0xff] }
  0x46   :  { %1758 = vmatpush.bf16.msrb.mxu2 %v3057_v58  ;;  %v121_v58 = vpack.c.bf16 %v97_v52, %v97_v52  ;;  %v3136_v52 = vld [vmem:[#allocation5 + $0x410] sm:$0xff] }
  0x47   :  { %1771 = vmatpush.bf16.msrb.mxu3 %v3065_v59  ;;  %v123_v59 = vpack.c.bf16 %v99_v53, %v99_v53  ;;  %v3144_v53 = vld [vmem:[#allocation5 + $0x450] sm:$0xff] }
  0x48   :  { %1733 = vmatpush.bf16.msrb.mxu0 %v3040_v60  ;;  %v3108_v60 = vld [vmem:[#allocation5 + $0x330] sm:$0xff] }
  0x49   :  { %1746 = vmatpush.bf16.msrb.mxu1 %v3048_v61  ;;  %v3116_v61 = vld [vmem:[#allocation5 + $0x370] sm:$0xff] }
  0x4a   :  { %1759 = vmatpush.bf16.msrb.mxu2 %v3056_v62  ;;  %v3124_v62 = vld [vmem:[#allocation5 + $0x3b0] sm:$0xff] }
  0x4b   :  { %1772 = vmatpush.bf16.msrb.mxu3 %v3064_v63  ;;  %v3132_v63 = vld [vmem:[#allocation5 + $0x3f0] sm:$0xff] }
  0x4c   :  { %1734 = vmatpush.bf16.msrb.mxu0 %v3039_v0  ;;  %v3107_v0 = vld [vmem:[#allocation5 + $0x328] sm:$0xff] }
  0x4d   :  { %1747 = vmatpush.bf16.msrb.mxu1 %v3047_v1  ;;  %v3115_v1 = vld [vmem:[#allocation5 + $0x368] sm:$0xff] }
  0x4e   :  { %1760 = vmatpush.bf16.msrb.mxu2 %v3055_v2  ;;  %v3123_v2 = vld [vmem:[#allocation5 + $0x3a8] sm:$0xff] }
  0x4f   :  { %1773 = vmatpush.bf16.msrb.mxu3 %v3063_v3  ;;  %v3131_v3 = vld [vmem:[#allocation5 + $0x3e8] sm:$0xff] }
  0x50   :  { %1735 = vmatpush.bf16.msrb.mxu0 %v3038_v4  ;;  %v3106_v4 = vld [vmem:[#allocation5 + $0x320] sm:$0xff] }
  0x51   :  { %1748 = vmatpush.bf16.msrb.mxu1 %v3046_v5  ;;  %v3114_v5 = vld [vmem:[#allocation5 + $0x360] sm:$0xff] }
  0x52   :  { %1761 = vmatpush.bf16.msrb.mxu2 %v3054_v6  ;;  %v3122_v6 = vld [vmem:[#allocation5 + $0x3a0] sm:$0xff] }
  0x53   :  { %1774 = vmatpush.bf16.msrb.mxu3 %v3062_v7  ;;  %1736 = vmatmul.bf16.vlgmr.msrb.gmra.mxu0 %v116_v17  ;;  %v3130_v7 = vld [vmem:[#allocation5 + $0x3e0] sm:$0xff]  ;;  %v3111_v17 = vld [vmem:[#allocation5 + $0x348] sm:$0xff] }
  0x54   :  { %1780 = vmatpush.bf16.msra.mxu0 %v3077_v8  ;;  %1749 = vmatmul.bf16.vlgmr.msrb.gmra.mxu1 %v117_v19  ;;  %v3105_v8 = vld [vmem:[#allocation5 + $0x318] sm:$0xff]  ;;  %v3127_v19 = vld [vmem:[#allocation5 + $0x3c8] sm:$0xff] }
  0x55   :  { %1793 = vmatpush.bf16.msra.mxu1 %v3085_v11  ;;  %1762 = vmatmul.bf16.vlgmr.msrb.gmra.mxu2 %v118_v16  ;;  %v3129_v11 = vld [vmem:[#allocation5 + $0x3d8] sm:$0xff]  ;;  %v3103_v16 = vld [vmem:[#allocation5 + $0x308] sm:$0xff] }
  0x56   :  { %1806 = vmatpush.bf16.msra.mxu2 %v3093_v14  ;;  %1775 = vmatmul.bf16.vlgmr.msrb.gmra.mxu3 %v119_v18  ;;  %v3120_v14 = vld [vmem:[#allocation5 + $0x390] sm:$0xff]  ;;  %v3119_v18 = vld [vmem:[#allocation5 + $0x388] sm:$0xff] }
  0x57   :  { %1819 = vmatpush.bf16.msra.mxu3 %v3101_v15  ;;  %v3128_v15 = vld [vmem:[#allocation5 + $0x3d0] sm:$0xff] }
  0x58   :  { %1781 = vmatpush.bf16.msra.mxu0 %v3076_v20  ;;  %v3102_v20 = vld [vmem:[#allocation5 + $0x300] sm:$0xff] }
  0x59   :  { %1794 = vmatpush.bf16.msra.mxu1 %v3084_v21  ;;  %v3110_v21 = vld [vmem:[#allocation5 + $0x340] sm:$0xff] }
  0x5a   :  { %1807 = vmatpush.bf16.msra.mxu2 %v3092_v22  ;;  %v3118_v22 = vld [vmem:[#allocation5 + $0x380] sm:$0xff] }
  0x5b   :  { %1820 = vmatpush.bf16.msra.mxu3 %v3100_v23  ;;  %v3126_v23 = vld [vmem:[#allocation5 + $0x3c0] sm:$0xff] }
  0x5c   :  { %1782 = vmatpush.bf16.msra.mxu0 %v3075_v24  ;;  %v3141_v24 = vld [vmem:[#allocation5 + $0x438] sm:$0xff] }
  0x5d   :  { %1795 = vmatpush.bf16.msra.mxu1 %v3083_v25  ;;  %v100_v25 = vld [vmem:[#allocation2 + $0x60] sm:$0xff] }
  0x5e   :  { %1808 = vmatpush.bf16.msra.mxu2 %v3091_v26  ;;  %v102_v26 = vld [vmem:[#allocation2 + $0x70] sm:$0xff] }
  0x5f   :  { %1821 = vmatpush.bf16.msra.mxu3 %v3099_v27  ;;  %v3149_v27 = vld [vmem:[#allocation5 + $0x478] sm:$0xff] }
  0x60   :  { %1783 = vmatpush.bf16.msra.mxu0 %v3074_v28  ;;  %v101_v28 = vld [vmem:[#allocation2 + $0x68] sm:$0xff] }
  0x61   :  { %1796 = vmatpush.bf16.msra.mxu1 %v3082_v29  ;;  %v103_v29 = vld [vmem:[#allocation2 + $0x78] sm:$0xff] }
  0x62   :  { %1809 = vmatpush.bf16.msra.mxu2 %v3090_v30  ;;  %v3157_v30 = vld [vmem:[#allocation5 + $0x4b8] sm:$0xff] }
  0x63   :  { %1822 = vmatpush.bf16.msra.mxu3 %v3098_v31  ;;  %v3165_v31 = vld [vmem:[#allocation5 + $0x4f8] sm:$0xff] }
  0x64   :  { %1784 = vmatpush.bf16.msra.mxu0 %v3073_v32  ;;  %v124_v32 = vpack.c.bf16 %v100_v25, %v100_v25 }
  0x65   :  { %1797 = vmatpush.bf16.msra.mxu1 %v3081_v33  ;;  %v126_v33 = vpack.c.bf16 %v102_v26, %v102_v26  ;;  %v3186_v26 = vld [vmem:[#allocation5 + $0x5a0] sm:$0xff] }
  0x66   :  { %1810 = vmatpush.bf16.msra.mxu2 %v3089_v34  ;;  %v125_v34 = vpack.c.bf16 %v101_v28, %v101_v28 }
  0x67   :  { %1823 = vmatpush.bf16.msra.mxu3 %v3097_v35  ;;  %v127_v35 = vpack.c.bf16 %v103_v29, %v103_v29  ;;  %v3169_v29 = vld [vmem:[#allocation5 + $0x518] sm:$0xff] }
  0x68   :  { %1785 = vmatpush.bf16.msra.mxu0 %v3072_v36  ;;  %v3140_v36 = vld [vmem:[#allocation5 + $0x430] sm:$0xff] }
  0x69   :  { %1798 = vmatpush.bf16.msra.mxu1 %v3080_v37  ;;  %v3148_v37 = vld [vmem:[#allocation5 + $0x470] sm:$0xff] }
  0x6a   :  { %1811 = vmatpush.bf16.msra.mxu2 %v3088_v38  ;;  %v3156_v38 = vld [vmem:[#allocation5 + $0x4b0] sm:$0xff] }
  0x6b   :  { %1824 = vmatpush.bf16.msra.mxu3 %v3096_v39  ;;  %v3164_v39 = vld [vmem:[#allocation5 + $0x4f0] sm:$0xff] }
  0x6c   :  { %1786 = vmatpush.bf16.msra.mxu0 %v3071_v40  ;;  %v3139_v40 = vld [vmem:[#allocation5 + $0x428] sm:$0xff] }
  0x6d   :  { %1799 = vmatpush.bf16.msra.mxu1 %v3079_v41  ;;  %v3147_v41 = vld [vmem:[#allocation5 + $0x468] sm:$0xff] }
  0x6e   :  { %1812 = vmatpush.bf16.msra.mxu2 %v3087_v42  ;;  %v3155_v42 = vld [vmem:[#allocation5 + $0x4a8] sm:$0xff] }
  0x6f   :  { %1825 = vmatpush.bf16.msra.mxu3 %v3095_v43  ;;  %v3163_v43 = vld [vmem:[#allocation5 + $0x4e8] sm:$0xff] }
  0x70   :  { %1787 = vmatpush.bf16.msra.mxu0 %v3070_v44  ;;  %v3138_v44 = vld [vmem:[#allocation5 + $0x420] sm:$0xff] }
  0x71   :  { %1800 = vmatpush.bf16.msra.mxu1 %v3078_v45  ;;  %v3146_v45 = vld [vmem:[#allocation5 + $0x460] sm:$0xff] }
  0x72   :  { %1813 = vmatpush.bf16.msra.mxu2 %v3086_v46  ;;  %v3154_v46 = vld [vmem:[#allocation5 + $0x4a0] sm:$0xff] }
  0x73   :  { %1826 = vmatpush.bf16.msra.mxu3 %v3094_v47  ;;  %1788 = vmatmul.bf16.vlgmr.msra.gmra.mxu0 %v120_v56  ;;  %v3162_v47 = vld [vmem:[#allocation5 + $0x4e0] sm:$0xff]  ;;  %v3135_v56 = vld [vmem:[#allocation5 + $0x408] sm:$0xff] }
  0x74   :  { %1832 = vmatpush.bf16.msrb.mxu0 %v3109_v48  ;;  %1801 = vmatmul.bf16.vlgmr.msra.gmra.mxu1 %v121_v58  ;;  %v3137_v48 = vld [vmem:[#allocation5 + $0x418] sm:$0xff]  ;;  %v3151_v58 = vld [vmem:[#allocation5 + $0x488] sm:$0xff] }
  0x75   :  { %1845 = vmatpush.bf16.msrb.mxu1 %v3117_v51  ;;  %1814 = vmatmul.bf16.vlgmr.msra.gmra.mxu2 %v122_v57  ;;  %v3161_v51 = vld [vmem:[#allocation5 + $0x4d8] sm:$0xff]  ;;  %v3143_v57 = vld [vmem:[#allocation5 + $0x448] sm:$0xff] }
  0x76   :  { %1858 = vmatpush.bf16.msrb.mxu2 %v3125_v54  ;;  %1827 = vmatmul.bf16.vlgmr.msra.gmra.mxu3 %v123_v59  ;;  %v3152_v54 = vld [vmem:[#allocation5 + $0x490] sm:$0xff]  ;;  %v3159_v59 = vld [vmem:[#allocation5 + $0x4c8] sm:$0xff] }
  0x77   :  { %1871 = vmatpush.bf16.msrb.mxu3 %v3133_v55  ;;  %v3160_v55 = vld [vmem:[#allocation5 + $0x4d0] sm:$0xff] }
  0x78   :  { %1833 = vmatpush.bf16.msrb.mxu0 %v3108_v60  ;;  %v3134_v60 = vld [vmem:[#allocation5 + $0x400] sm:$0xff] }
  0x79   :  { %1846 = vmatpush.bf16.msrb.mxu1 %v3116_v61  ;;  %v3142_v61 = vld [vmem:[#allocation5 + $0x440] sm:$0xff] }
  0x7a   :  { %1859 = vmatpush.bf16.msrb.mxu2 %v3124_v62  ;;  %v3150_v62 = vld [vmem:[#allocation5 + $0x480] sm:$0xff] }
  0x7b   :  { %1872 = vmatpush.bf16.msrb.mxu3 %v3132_v63  ;;  %v3158_v63 = vld [vmem:[#allocation5 + $0x4c0] sm:$0xff] }
  0x7c   :  { %1834 = vmatpush.bf16.msrb.mxu0 %v3107_v0  ;;  %v3173_v0 = vld [vmem:[#allocation5 + $0x538] sm:$0xff] }
  0x7d   :  { %1847 = vmatpush.bf16.msrb.mxu1 %v3115_v1  ;;  %v104_v1 = vld [vmem:[#allocation2 + $0x80] sm:$0xff] }
  0x7e   :  { %1860 = vmatpush.bf16.msrb.mxu2 %v3123_v2  ;;  %v106_v2 = vld [vmem:[#allocation2 + $0x90] sm:$0xff] }
  0x7f   :  { %1873 = vmatpush.bf16.msrb.mxu3 %v3131_v3  ;;  %v3181_v3 = vld [vmem:[#allocation5 + $0x578] sm:$0xff] }
  0x80   :  { %1835 = vmatpush.bf16.msrb.mxu0 %v3106_v4  ;;  %v105_v4 = vld [vmem:[#allocation2 + $0x88] sm:$0xff] }
  0x81   :  { %1848 = vmatpush.bf16.msrb.mxu1 %v3114_v5  ;;  %v107_v5 = vld [vmem:[#allocation2 + $0x98] sm:$0xff] }
  0x82   :  { %1861 = vmatpush.bf16.msrb.mxu2 %v3122_v6  ;;  %v3189_v6 = vld [vmem:[#allocation5 + $0x5b8] sm:$0xff] }
  0x83   :  { %1874 = vmatpush.bf16.msrb.mxu3 %v3130_v7  ;;  %v3197_v7 = vld [vmem:[#allocation5 + $0x5f8] sm:$0xff] }
  0x84   :  { %1836 = vmatpush.bf16.msrb.mxu0 %v3105_v8  ;;  %v128_v8 = vpack.c.bf16 %v104_v1, %v104_v1 }
  0x85   :  { %1849 = vmatpush.bf16.msrb.mxu1 %v3113_v9  ;;  %v130_v9 = vpack.c.bf16 %v106_v2, %v106_v2 }
  0x86   :  { %1862 = vmatpush.bf16.msrb.mxu2 %v3121_v10  ;;  %v129_v10 = vpack.c.bf16 %v105_v4, %v105_v4 }
  0x87   :  { %1875 = vmatpush.bf16.msrb.mxu3 %v3129_v11  ;;  %v131_v11 = vpack.c.bf16 %v107_v5, %v107_v5 }
  0x88   :  { %1837 = vmatpush.bf16.msrb.mxu0 %v3104_v12  ;;  %v3172_v12 = vld [vmem:[#allocation5 + $0x530] sm:$0xff] }
  0x89   :  { %1850 = vmatpush.bf16.msrb.mxu1 %v3112_v13  ;;  %v3180_v13 = vld [vmem:[#allocation5 + $0x570] sm:$0xff] }
  0x8a   :  { %1863 = vmatpush.bf16.msrb.mxu2 %v3120_v14  ;;  %v3188_v14 = vld [vmem:[#allocation5 + $0x5b0] sm:$0xff] }
  0x8b   :  { %1876 = vmatpush.bf16.msrb.mxu3 %v3128_v15  ;;  %v3196_v15 = vld [vmem:[#allocation5 + $0x5f0] sm:$0xff] }
  0x8c   :  { %1838 = vmatpush.bf16.msrb.mxu0 %v3103_v16  ;;  %v3171_v16 = vld [vmem:[#allocation5 + $0x528] sm:$0xff] }
  0x8d   :  { %1851 = vmatpush.bf16.msrb.mxu1 %v3111_v17  ;;  %v3179_v17 = vld [vmem:[#allocation5 + $0x568] sm:$0xff] }
  0x8e   :  { %1864 = vmatpush.bf16.msrb.mxu2 %v3119_v18  ;;  %v3221_v18 = vld [vmem:[%s3425_s2] ss:$0 sm:$0xff] }
  0x8f   :  { %1877 = vmatpush.bf16.msrb.mxu3 %v3127_v19  ;;  %v3187_v19 = vld [vmem:[#allocation5 + $0x5a8] sm:$0xff] }
  0x90   :  { %1839 = vmatpush.bf16.msrb.mxu0 %v3102_v20  ;;  %v3195_v20 = vld [vmem:[#allocation5 + $0x5e8] sm:$0xff] }
  0x91   :  { %1852 = vmatpush.bf16.msrb.mxu1 %v3110_v21 }
  0x92   :  { %1865 = vmatpush.bf16.msrb.mxu2 %v3118_v22  ;;  %v3170_v22 = vld [vmem:[#allocation5 + $0x520] sm:$0xff] }
  0x93   :  { %1878 = vmatpush.bf16.msrb.mxu3 %v3126_v23  ;;  %1840 = vmatmul.bf16.vlgmr.msrb.gmra.mxu0 %v124_v32  ;;  %v3178_v23 = vld [vmem:[#allocation5 + $0x560] sm:$0xff]  ;;  %v3193_v32 = vld [vmem:[#allocation5 + $0x5d8] sm:$0xff] }
  0x94   :  { %1884 = vmatpush.bf16.msra.mxu0 %v3141_v24  ;;  %1853 = vmatmul.bf16.vlgmr.msrb.gmra.mxu1 %v125_v34 }
  0x95   :  { %1897 = vmatpush.bf16.msra.mxu1 %v3149_v27  ;;  %1866 = vmatmul.bf16.vlgmr.msrb.gmra.mxu2 %v126_v33  ;;  %v3194_v27 = vld [vmem:[#allocation5 + $0x5e0] sm:$0xff] }
  0x96   :  { %1910 = vmatpush.bf16.msra.mxu2 %v3157_v30  ;;  %1879 = vmatmul.bf16.vlgmr.msrb.gmra.mxu3 %v127_v35  ;;  %v3177_v30 = vld [vmem:[#allocation5 + $0x558] sm:$0xff] }
  0x97   :  { %1923 = vmatpush.bf16.msra.mxu3 %v3165_v31  ;;  %v3185_v31 = vld [vmem:[#allocation5 + $0x598] sm:$0xff] }
  0x98   :  { %1885 = vmatpush.bf16.msra.mxu0 %v3140_v36 }
  0x99   :  { %1898 = vmatpush.bf16.msra.mxu1 %v3148_v37  ;;  %v3168_v37 = vld [vmem:[#allocation5 + $0x510] sm:$0xff] }
  0x9a   :  { %1911 = vmatpush.bf16.msra.mxu2 %v3156_v38  ;;  %v3176_v38 = vld [vmem:[#allocation5 + $0x550] sm:$0xff] }
  0x9b   :  { %1924 = vmatpush.bf16.msra.mxu3 %v3164_v39 }
  0x9c   :  { %1886 = vmatpush.bf16.msra.mxu0 %v3139_v40 }
  0x9d   :  { %1899 = vmatpush.bf16.msra.mxu1 %v3147_v41  ;;  %v3184_v41 = vld [vmem:[#allocation5 + $0x590] sm:$0xff] }
  0x9e   :  { %1912 = vmatpush.bf16.msra.mxu2 %v3155_v42  ;;  %v3192_v42 = vld [vmem:[#allocation5 + $0x5d0] sm:$0xff] }
  0x9f   :  { %1925 = vmatpush.bf16.msra.mxu3 %v3163_v43  ;;  %v3167_v43 = vld [vmem:[#allocation5 + $0x508] sm:$0xff] }
  0xa0   :  { %1887 = vmatpush.bf16.msra.mxu0 %v3138_v44  ;;  %v3175_v44 = vld [vmem:[#allocation5 + $0x548] sm:$0xff] }
  0xa1   :  { %1900 = vmatpush.bf16.msra.mxu1 %v3146_v45  ;;  %v3183_v45 = vld [vmem:[#allocation5 + $0x588] sm:$0xff] }
  0xa2   :  { %1913 = vmatpush.bf16.msra.mxu2 %v3154_v46  ;;  %v3191_v46 = vld [vmem:[#allocation5 + $0x5c8] sm:$0xff] }
  0xa3   :  { %1926 = vmatpush.bf16.msra.mxu3 %v3162_v47 }
  0xa4   :  { %1888 = vmatpush.bf16.msra.mxu0 %v3137_v48 }
  0xa5   :  { %1901 = vmatpush.bf16.msra.mxu1 %v3145_v49  ;;  %v3166_v49 = vld [vmem:[#allocation5 + $0x500] sm:$0xff] }
  0xa6   :  { %1914 = vmatpush.bf16.msra.mxu2 %v3153_v50  ;;  %v3174_v50 = vld [vmem:[#allocation5 + $0x540] sm:$0xff] }
  0xa7   :  { %1927 = vmatpush.bf16.msra.mxu3 %v3161_v51  ;;  %v3182_v51 = vld [vmem:[#allocation5 + $0x580] sm:$0xff] }
  0xa8   :  { %1889 = vmatpush.bf16.msra.mxu0 %v3136_v52  ;;  %v108_v52 = vld [vmem:[#allocation2 + $0xa0] sm:$0xff] }
  0xa9   :  { %1902 = vmatpush.bf16.msra.mxu1 %v3144_v53  ;;  %v109_v53 = vld [vmem:[#allocation2 + $0xa8] sm:$0xff] }
  0xaa   :  { %1915 = vmatpush.bf16.msra.mxu2 %v3152_v54  ;;  %v3190_v54 = vld [vmem:[#allocation5 + $0x5c0] sm:$0xff] }
  0xab   :  { %1928 = vmatpush.bf16.msra.mxu3 %v3160_v55  ;;  %v110_v55 = vld [vmem:[#allocation2 + $0xb0] sm:$0xff] }
  0xac   :  { %1890 = vmatpush.bf16.msra.mxu0 %v3135_v56  ;;  %v111_v56 = vld [vmem:[#allocation2 + $0xb8] sm:$0xff] }
  0xad   :  { %1903 = vmatpush.bf16.msra.mxu1 %v3143_v57  ;;  %v132_v57 = vpack.c.bf16 %v108_v52, %v108_v52  ;;  %v3211_v52 = vld [vmem:[#allocation8 + $0x28] sm:$0xff] }
  0xae   :  { %1916 = vmatpush.bf16.msra.mxu2 %v3151_v58  ;;  %v133_v58 = vpack.c.bf16 %v109_v53, %v109_v53 }
  0xaf   :  { %1929 = vmatpush.bf16.msra.mxu3 %v3159_v59  ;;  %v134_v59 = vpack.c.bf16 %v110_v55, %v110_v55 }
  0xb0   :  { %1891 = vmatpush.bf16.msra.mxu0 %v3134_v60  ;;  %v1685_v21 = vpop.f32.mrf.mxu0  ;;  %v135_v60 = vpack.c.bf16 %v111_v56, %v111_v56  ;;  %v3209_v56 = vld [vmem:[#allocation8 + $0x18] sm:$0xff] }
  0xb1   :  { %1904 = vmatpush.bf16.msra.mxu1 %v3142_v61  ;;  %v1686_v24 = vadd.f32 %v3221_v18, %v1685_v21  ;;  %v1698_v25 = vpop.f32.mrf.mxu1 }
  0xb2   :  { %1917 = vmatpush.bf16.msra.mxu2 %v3150_v62 }
  0xb3   :  { %1930 = vmatpush.bf16.msra.mxu3 %v3158_v63  ;;  %1892 = vmatmul.bf16.vlgmr.msra.gmra.mxu0 %v128_v8  ;;  %v1699_v28 = vadd.f32 %v1698_v25, %v1686_v24  ;;  %v3205_v25 = vld [vmem:[#allocation7 + $0x38] sm:$0xff] }
  0xb4   :  { %1936 = vmatpush.bf16.msrb.mxu0 %v3173_v0  ;;  %1905 = vmatmul.bf16.vlgmr.msra.gmra.mxu1 %v129_v10 }
  0xb5   :  { %1949 = vmatpush.bf16.msrb.mxu1 %v3181_v3  ;;  %1918 = vmatmul.bf16.vlgmr.msra.gmra.mxu2 %v130_v9 }
  0xb6   :  { %1962 = vmatpush.bf16.msrb.mxu2 %v3189_v6  ;;  %1931 = vmatmul.bf16.vlgmr.msra.gmra.mxu3 %v131_v11 }
  0xb7   :  { %1975 = vmatpush.bf16.msrb.mxu3 %v3197_v7 }
  0xb8   :  { %1937 = vmatpush.bf16.msrb.mxu0 %v3172_v12  ;;  %v1711_v33 = vpop.f32.mrf.mxu2  ;;  %v1687_v36 = vpop.f32.mrf.mxu0 }
  0xb9   :  { %1950 = vmatpush.bf16.msrb.mxu1 %v3180_v13  ;;  %v1712_v34 = vadd.f32 %v1711_v33, %v1699_v28  ;;  %v1724_v35 = vpop.f32.mrf.mxu3  ;;  %v1700_v40 = vpop.f32.mrf.mxu1  ;;  %v3204_v28 = vld [vmem:[#allocation7 + $0x30] sm:$0xff]  ;;  %v3201_v33 = vld [vmem:[#allocation7 + $0x18] sm:$0xff] }
  0xba   :  { %1963 = vmatpush.bf16.msrb.mxu2 %v3188_v14 }
  0xbb   :  { %1976 = vmatpush.bf16.msrb.mxu3 %v3196_v15  ;;  %v1725_v39 = vadd.f32 %v1724_v35, %v1712_v34  ;;  %v3200_v35 = vld [vmem:[#allocation7 + $0x10] sm:$0xff] }
  0xbc   :  { %1938 = vmatpush.bf16.msrb.mxu0 %v3171_v16 }
  0xbd   :  { %1951 = vmatpush.bf16.msrb.mxu1 %v3179_v17 }
  0xbe   :  { %1964 = vmatpush.bf16.msrb.mxu2 %v3187_v19 }
  0xbf   :  { %1977 = vmatpush.bf16.msrb.mxu3 %v3195_v20 }
  0xc0   :  { %1939 = vmatpush.bf16.msrb.mxu0 %v3170_v22  ;;  %v1713_v47 = vpop.f32.mrf.mxu2 }
  0xc1   :  { %1952 = vmatpush.bf16.msrb.mxu1 %v3178_v23  ;;  %v1726_v48 = vpop.f32.mrf.mxu3 }
  0xc2   :  { %1965 = vmatpush.bf16.msrb.mxu2 %v3186_v26 }
  0xc3   :  { %1978 = vmatpush.bf16.msrb.mxu3 %v3194_v27 }
  0xc4   :  { %1940 = vmatpush.bf16.msrb.mxu0 %v3169_v29  ;;  %v3203_v29 = vld [vmem:[#allocation7 + $0x28] sm:$0xff] }
  0xc5   :  { %1953 = vmatpush.bf16.msrb.mxu1 %v3177_v30 }
  0xc6   :  { %1966 = vmatpush.bf16.msrb.mxu2 %v3185_v31 }
  0xc7   :  { %1979 = vmatpush.bf16.msrb.mxu3 %v3193_v32  ;;  %v3202_v32 = vld [vmem:[#allocation7 + $0x20] sm:$0xff] }
  0xc8   :  { %1941 = vmatpush.bf16.msrb.mxu0 %v3168_v37  ;;  %v3199_v37 = vld [vmem:[#allocation7 + $0x8] sm:$0xff] }
  0xc9   :  { %1954 = vmatpush.bf16.msrb.mxu1 %v3176_v38 }
  0xca   :  { %1967 = vmatpush.bf16.msrb.mxu2 %v3184_v41 }
  0xcb   :  { %1980 = vmatpush.bf16.msrb.mxu3 %v3192_v42  ;;  %v3198_v42 = vld [vmem:[#allocation7] sm:$0xff] }
  0xcc   :  { %1942 = vmatpush.bf16.msrb.mxu0 %v3167_v43 }
  0xcd   :  { %1955 = vmatpush.bf16.msrb.mxu1 %v3175_v44 }
  0xce   :  { %1968 = vmatpush.bf16.msrb.mxu2 %v3183_v45 }
  0xcf   :  { %1981 = vmatpush.bf16.msrb.mxu3 %v3191_v46  ;;  %v3213_v46 = vld [vmem:[#allocation8 + $0x38] sm:$0xff] }
  0xd0   :  { %1943 = vmatpush.bf16.msrb.mxu0 %v3166_v49  ;;  %v1737_v61 = vpop.f32.mrf.mxu0  ;;  %v3212_v49 = vld [vmem:[#allocation8 + $0x30] sm:$0xff] }
  0xd1   :  { %1956 = vmatpush.bf16.msrb.mxu1 %v3174_v50  ;;  %v1738_v62 = vadd.f32 %v1737_v61, %v1725_v39  ;;  %v1750_v63 = vpop.f32.mrf.mxu1  ;;  %v3208_v61 = vld [vmem:[#allocation8 + $0x10] sm:$0xff] }
  0xd2   :  { %1969 = vmatpush.bf16.msrb.mxu2 %v3182_v51 }
  0xd3   :  { %1982 = vmatpush.bf16.msrb.mxu3 %v3190_v54  ;;  %1944 = vmatmul.bf16.vlgmr.msrb.gmra.mxu0 %v132_v57  ;;  %v1751_v0 = vadd.f32 %v1750_v63, %v1738_v62  ;;  %v3210_v54 = vld [vmem:[#allocation8 + $0x20] sm:$0xff] }
  0xd4   :  { %1957 = vmatmul.bf16.vlgmr.msrb.gmra.mxu1 %v133_v58  ;;  %2058 = vmatpush.bf16.msra.mxu0 %v3205_v25 }
  0xd5   :  { %1970 = vmatmul.bf16.vlgmr.msrb.gmra.mxu2 %v134_v59  ;;  %2141 = vmatpush.bf16.msra.mxu1 %v3213_v46 }
  0xd6   :  { %1983 = vmatmul.bf16.vlgmr.msrb.gmra.mxu3 %v135_v60 }
  0xd8   :  { %v1763_v1 = vpop.f32.mrf.mxu2  ;;  %v1739_v4 = vpop.f32.mrf.mxu0  ;;  %2059 = vmatpush.bf16.msra.mxu0 %v3204_v28 }
  0xd9   :  { %v1764_v2 = vadd.f32 %v1763_v1, %v1751_v0  ;;  %v1776_v3 = vpop.f32.mrf.mxu3  ;;  %v1752_v6 = vpop.f32.mrf.mxu1  ;;  %2142 = vmatpush.bf16.msra.mxu1 %v3212_v49 }
  0xdb   :  { %v1777_v5 = vadd.f32 %v1776_v3, %v1764_v2 }
  0xdc   :  { %2060 = vmatpush.bf16.msra.mxu0 %v3203_v29 }
  0xdd   :  { %2143 = vmatpush.bf16.msra.mxu1 %v3211_v52 }
  0xe0   :  { %v1765_v7 = vpop.f32.mrf.mxu2  ;;  %2061 = vmatpush.bf16.msra.mxu0 %v3202_v32 }
  0xe1   :  { %v1778_v8 = vpop.f32.mrf.mxu3  ;;  %2144 = vmatpush.bf16.msra.mxu1 %v3210_v54 }
  0xe4   :  { %2062 = vmatpush.bf16.msra.mxu0 %v3201_v33 }
  0xe5   :  { %2145 = vmatpush.bf16.msra.mxu1 %v3209_v56 }
  0xe8   :  { %2063 = vmatpush.bf16.msra.mxu0 %v3200_v35 }
  0xe9   :  { %2146 = vmatpush.bf16.msra.mxu1 %v3208_v61 }
  0xec   :  { %2064 = vmatpush.bf16.msra.mxu0 %v3199_v37 }
  0xf0   :  { %v1789_v9 = vpop.f32.mrf.mxu0  ;;  %2065 = vmatpush.bf16.msra.mxu0 %v3198_v42 }
  0xf1   :  { %v1790_v10 = vadd.f32 %v1789_v9, %v1777_v5  ;;  %v1802_v11 = vpop.f32.mrf.mxu1  ;;  %v3207_v9 = vld [vmem:[#allocation8 + $0x8] sm:$0xff] }
  0xf2   :  { %2147 = vmatpush.bf16.msra.mxu1 %v3207_v9 }
  0xf3   :  { %v1803_v12 = vadd.f32 %v1802_v11, %v1790_v10  ;;  %v3206_v10 = vld [vmem:[#allocation8] sm:$0xff] }
  0xf4   :  { %v3222_v11 = vld [vmem:[%s3427_s4] ss:$0 sm:$0xff] }
  0xf6   :  { %2148 = vmatpush.bf16.msra.mxu1 %v3206_v10 }
  0xf8   :  { %v1815_v13 = vpop.f32.mrf.mxu2  ;;  %v1791_v16 = vpop.f32.mrf.mxu0 }
  0xf9   :  { %v1816_v14 = vadd.f32 %v1815_v13, %v1803_v12  ;;  %v1828_v15 = vpop.f32.mrf.mxu3  ;;  %v1804_v18 = vpop.f32.mrf.mxu1 }
  0xfb   :  { %v1829_v17 = vadd.f32 %v1828_v15, %v1816_v14 }
 0x100   :  { %v1817_v19 = vpop.f32.mrf.mxu2 }
 0x101   :  { %v1830_v20 = vpop.f32.mrf.mxu3 }
 0x110   :  { %v1841_v21 = vpop.f32.mrf.mxu0 }
 0x111   :  { %v1854_v22 = vpop.f32.mrf.mxu1  ;;  %v1842_v39 = vadd.f32 %v1841_v21, %v1829_v17  ;;  %v3223_v17 = vld [vmem:[%s3429_s6] ss:$0 sm:$0xff] }
 0x113   :  { %v1855_v44 = vadd.f32 %v1854_v22, %v1842_v39 }
 0x118   :  { %v1867_v23 = vpop.f32.mrf.mxu2  ;;  %v1843_v26 = vpop.f32.mrf.mxu0 }
 0x119   :  { %v1880_v24 = vpop.f32.mrf.mxu3  ;;  %v1856_v27 = vpop.f32.mrf.mxu1  ;;  %v1868_v45 = vadd.f32 %v1867_v23, %v1855_v44 }
 0x11b   :  { %v1881_v50 = vadd.f32 %v1880_v24, %v1868_v45 }
 0x120   :  { %v1869_v30 = vpop.f32.mrf.mxu2 }
 0x121   :  { %v1882_v31 = vpop.f32.mrf.mxu3 }
 0x130   :  { %v1893_v34 = vpop.f32.mrf.mxu0 }
 0x131   :  { %v1906_v36 = vpop.f32.mrf.mxu1  ;;  %v1894_v51 = vadd.f32 %v1893_v34, %v1881_v50 }
 0x133   :  { %v1907_v53 = vadd.f32 %v1906_v36, %v1894_v51 }
 0x138   :  { %v1919_v38 = vpop.f32.mrf.mxu2  ;;  %v1895_v41 = vpop.f32.mrf.mxu0 }
 0x139   :  { %v1932_v40 = vpop.f32.mrf.mxu3  ;;  %v1908_v43 = vpop.f32.mrf.mxu1  ;;  %v1920_v55 = vadd.f32 %v1919_v38, %v1907_v53 }
 0x13b   :  { %v1933_v57 = vadd.f32 %v1932_v40, %v1920_v55 }
 0x140   :  { %v1921_v47 = vpop.f32.mrf.mxu2 }
 0x141   :  { %v1934_v48 = vpop.f32.mrf.mxu3 }
 0x150   :  { %v1945_v58 = vpop.f32.mrf.mxu0 }
 0x151   :  { %v1958_v59 = vpop.f32.mrf.mxu1  ;;  %v1946_v60 = vadd.f32 %v1945_v58, %v1933_v57 }
 0x153   :  { %v1959_v62 = vadd.f32 %v1958_v59, %v1946_v60 }
 0x158   :  { %v1971_v63 = vpop.f32.mrf.mxu2  ;;  %v1947_v2 = vpop.f32.mrf.mxu0 }
 0x159   :  { %v1984_v0 = vpop.f32.mrf.mxu3  ;;  %v1972_v1 = vadd.f32 %v1971_v63, %v1959_v62  ;;  %v1960_v3 = vpop.f32.mrf.mxu1 }
 0x15b   :  { %v1985_v4 = vadd.f32 %v1984_v0, %v1972_v1 }
 0x15d   :  { %v1988_v5 = vmax.f32 %v1985_v4, 0.0 }
 0x15f   :  { %v1989_v6 = vpack.c.bf16 %v1988_v5, %v1988_v5 }
 0x160   :  { %v1973_v7 = vpop.f32.mrf.mxu2 }
 0x161   :  { %v1986_v8 = vpop.f32.mrf.mxu3  ;;  %2066 = vmatmul.bf16.vlgmr.msra.gmra.mxu0 %v1989_v6 }
 0x1de   :  { %v2067_v12 = vpop.f32.mrf.mxu0 }
 0x1df   :  { %v2068_v13 = vadd.f32 %v3222_v11, %v2067_v12 }
 0x1e1   :  { %v2071_v14 = vmax.f32 %v2068_v13, 0.0 }
 0x1e3   :  { %v2072_v15 = vpack.c.bf16 %v2071_v14, %v2071_v14 }
 0x1e5   :  { %2149 = vmatmul.bf16.vlgmr.msra.gmra.mxu1 %v2072_v15 }
 0x1e6   :  { %v2069_v16 = vpop.f32.mrf.mxu0 }
 0x262   :  { %v2150_v18 = vpop.f32.mrf.mxu1 }
 0x263   :  { %v2151_v19 = vadd.f32 %v3223_v17, %v2150_v18 }
 0x265   :  { %2154 = vst [vmem:[#allocation10] sm:$0xff] %v2151_v19 }
 0x266   :  { %2165 = dma.vmem_to_hbm [thread:$0]  %s2161_s25, 128, %s2163_s28, [#allocation4]  }
 0x26a   :  { %v2152_v20 = vpop.f32.mrf.mxu1 }
 0x26b   :  { %3350 = dma.done.wait [#allocation4], 128  }
 0x26c   :  { %3351 = vsyncadd [#allocation4], 4294967168 }
 0x26d   :  { %2170 = vsyncpa [#allocation3], 1 }
 0x26e   :  { %2171 = vsyncpa [#allocation6], 1 }
 0x26f   :  { %2172 = vsyncpa [#allocation9], 1 }
 0x270   :  { %2173 = vsyncpa [#allocation4], 1 }

</bundles_post_ra>
